<compile_context>
chip_gen: v5e
topology: v5e:2x2
jax: 0.10.0
libtpu: 0.0.40
codegen_flags: <defaults>
</compile_context>

<pallas_src>
import numpy as np
import jax
import jax.numpy as jnp
from jax.experimental import pallas as pl
from jax.experimental.pallas import tpu as pltpu


def _round_up(x: int, m: int) -> int:
    return ((x + m - 1) // m) * m


def _make_kernel(*, tk: int, single_k: bool, pool_resident: bool, precision):
    """Build the fused mean-map kernel body for the chosen configuration."""

    def _pool_slice(p_ref, off_ref, f, k_blk):
        if pool_resident:
            start = pl.multiple_of((off_ref[f] + k_blk) * tk, 128)
            return p_ref[pl.ds(start, tk), :]
        return p_ref[...]  # already the (tk, d_pad) K slice

    def kernel(off_ref, nk_ref, x_ref, p_ref, s_ref, o_ref, *scratch):
        f = pl.program_id(1)
        if single_k:
            p = _pool_slice(p_ref, off_ref, f, 0)
            acc = jnp.dot(x_ref[...], p, preferred_element_type=jnp.float32,
                          precision=precision)
            o_ref[...] = (acc * s_ref[0]).astype(o_ref.dtype)
        else:
            acc_ref, = scratch
            k = pl.program_id(2)

            @pl.when(k == 0)
            def _init():
                acc_ref[...] = jnp.zeros_like(acc_ref)

            # Skip MXU work for K steps past this feature's true length.
            @pl.when(k < nk_ref[f])
            def _accumulate():
                p = _pool_slice(p_ref, off_ref, f, k)
                acc_ref[...] += jnp.dot(x_ref[...], p,
                                        preferred_element_type=jnp.float32,
                                        precision=precision)

            @pl.when(k == pl.num_programs(2) - 1)
            def _writeback():
                o_ref[...] = (acc_ref[...] * s_ref[0]).astype(o_ref.dtype)

    return kernel


def preprocessing(features, output_dim: int, *, tile_n: int = 512,
                  tile_k: int = 1024, compute_dtype=None) -> jax.Array:
    """Pallas equivalent of Preprocessing(input_dims, output_dim)(features)."""
    features = [jnp.asarray(f) for f in features]
    num_features = len(features)
    N = int(features[0].shape[0])
    out_dtype = features[0].dtype

    # bf16 inputs stream as bf16 (mask matmul is exact in bf16, f32 accumulate);
    # everything else computes in f32.
    if compute_dtype is None:
        compute_dtype = jnp.bfloat16 if out_dtype == jnp.bfloat16 else jnp.float32
    item = jnp.dtype(compute_dtype).itemsize
    out_item = jnp.dtype(out_dtype).itemsize

    flats, lengths = [], []
    for f in features:
        fl = f.reshape(N, -1)
        lengths.append(int(fl.shape[1]))
        if fl.dtype != compute_dtype:   # skip no-op casts (no extra HBM copy)
            fl = fl.astype(compute_dtype)
        flats.append(fl)
    L_max = max(lengths)

    # Tile sizes: batch tile up to tile_n (mult of 8), reduction tile up to
    # tile_k (mult of 128); shrink for small problems to avoid over-padding.
    tn = min(tile_n, _round_up(N, 8))
    tk = min(tile_k, _round_up(L_max, 128))
    n_pad = _round_up(N, tn)
    d_pad = _round_up(output_dim, 128)          # lane-dense output stores

    # Per-feature padding only to its own tk multiple; concatenate along L.
    l_pads = [_round_up(L, tk) for L in lengths]
    nk_arr = np.asarray([lp // tk for lp in l_pads], np.int32)   # K steps / feature
    off_arr = np.zeros(num_features, np.int32)                   # block offsets
    off_arr[1:] = np.cumsum(nk_arr[:-1])
    Ltot = int(sum(l_pads))
    nk_max = int(nk_arr.max())
    single_k = (nk_max == 1)

    # Staging copy of the inputs (padded + concatenated).
    # TODO(synk): for very large feature maps, stream each feature from HBM with
    # manual DMA (memory_space=pl.ANY) to eliminate this staging pass entirely.
    x = jnp.concatenate(
        [jnp.pad(fl, ((0, n_pad - N), (0, lp - L)))
         for fl, L, lp in zip(flats, lengths, l_pads)], axis=1)

    # Exact 0/1 pooling-membership mask (MXU operand) + f32 1/count scale (VPU).
    pool_np = np.zeros((Ltot, d_pad), np.float32)
    scale_np = np.zeros((num_features, 1, d_pad), np.float32)
    idx = np.arange(output_dim)
    for fi, (L, ob) in enumerate(zip(lengths, off_arr)):
        starts = (idx * L) // output_dim                 # floor(i*L/d)
        ends = -((-(idx + 1) * L) // output_dim)         # ceil((i+1)*L/d)
        j = np.arange(L)
        mask = (j[:, None] >= starts[None, :]) & (j[:, None] < ends[None, :])
        r0 = int(ob) * tk
        pool_np[r0:r0 + L, :output_dim] = mask
        scale_np[fi, 0, :output_dim] = 1.0 / (ends - starts)
    pool = jnp.asarray(pool_np, dtype=compute_dtype)
    scale = jnp.asarray(scale_np)                        # stays f32

    # VMEM budgeting: cap at 75% of physical VMEM (48 MiB on v7x, 96 MiB v5e/v6e).
    try:
        phys_vmem = int(pltpu.get_tpu_info().vmem_capacity_bytes)
    except Exception:
        phys_vmem = 64 * 1024 * 1024
    vmem_cap = phys_vmem * 3 // 4

    base = (2 * tn * tk * item              # x double buffer
            + 2 * d_pad * 4                 # scale
            + 2 * tn * d_pad * out_item     # output double buffer
            + (0 if single_k else tn * d_pad * 4))   # f32 accumulator
    pool_resident = base + 2 * Ltot * d_pad * item <= vmem_cap
    pool_bytes = 2 * (Ltot if pool_resident else tk) * d_pad * item
    vmem_limit = int(min(max((base + pool_bytes) * 5 // 4, 32 * 1024 * 1024),
                         vmem_cap))

    if pool_resident:
        # Constant block index -> the whole pool is DMA'd once for the kernel.
        pool_spec = pl.BlockSpec((Ltot, d_pad), lambda i, f, k, off, nk: (0, 0))
    else:
        # Streamed fallback; clamped K index lets Pallas skip redundant DMAs.
        pool_spec = pl.BlockSpec(
            (tk, d_pad),
            lambda i, f, k, off, nk: (off[f] + jnp.minimum(k, nk[f] - 1), 0))

    precision = (jax.lax.Precision.HIGHEST
                 if compute_dtype == jnp.float32 else None)
    kernel = _make_kernel(tk=tk, single_k=single_k,
                          pool_resident=pool_resident, precision=precision)

    grid_spec = pltpu.PrefetchScalarGridSpec(
        num_scalar_prefetch=2,
        grid=(n_pad // tn, num_features, nk_max),   # N tiles lead (v7x megacore)
        in_specs=[
            pl.BlockSpec(
                (tn, tk),
                lambda i, f, k, off, nk: (i, off[f] + jnp.minimum(k, nk[f] - 1))),
            pool_spec,
            pl.BlockSpec((1, 1, d_pad), lambda i, f, k, off, nk: (f, 0, 0)),
        ],
        out_specs=pl.BlockSpec((tn, d_pad), lambda i, f, k, off, nk: (i, f)),
        scratch_shapes=([] if single_k
                        else [pltpu.VMEM((tn, d_pad), jnp.float32)]),
    )

    out = pl.pallas_call(
        kernel,
        out_shape=jax.ShapeDtypeStruct((n_pad, num_features * d_pad), out_dtype),
        grid_spec=grid_spec,
        compiler_params=pltpu.CompilerParams(
            dimension_semantics=("parallel", "parallel", "arbitrary"),
            vmem_limit_bytes=vmem_limit,
        ),
    )(jnp.asarray(off_arr), jnp.asarray(nk_arr), x, pool, scale)

    # (n_pad, F*d_pad) -> (n_pad, F, d_pad): trailing-dim reshape (no transpose),
    # then slice off batch / output padding.
    return out.reshape(n_pad, num_features, d_pad)[:N, :, :output_dim]


def _reference_adaptive_pool(x: np.ndarray, out_dim: int) -> np.ndarray:
    """Pure-numpy reference matching F.adaptive_avg_pool1d semantics."""
    N = x.shape[0]
    flat = x.reshape(N, -1)
    L = flat.shape[1]
    out = np.zeros((N, out_dim), np.float32)
    for i in range(out_dim):
        s = (i * L) // out_dim
        e = -((-(i + 1) * L) // out_dim)
        out[:, i] = flat[:, s:e].mean(axis=1)
    return out


if __name__ == "__main__":
    key = jax.random.PRNGKey(0)
    N = 10                        # not a multiple of 8: exercises batch padding
    output_dim = 16               # lane-padded to 128 internally
    # Mixed-rank features (like backbone feature maps) with uneven flattened
    # lengths 36 / 68 / 157: exercises reshape, adaptive bucketing, padding.
    feature_shapes = [(N, 4, 3, 3), (N, 68), (N, 157)]
    keys = jax.random.split(key, len(feature_shapes))
    features = [jax.random.normal(k, s, dtype=jnp.float32)
                for k, s in zip(keys, feature_shapes)]

    out = jax.block_until_ready(preprocessing(features, output_dim))

    # Sanity check against exact adaptive_avg_pool1d semantics.
    ref = np.stack([_reference_adaptive_pool(np.asarray(f), output_dim)
                    for f in features], axis=1)
    assert out.shape == (N, len(feature_shapes), output_dim)
    np.testing.assert_allclose(np.asarray(out), ref, rtol=1e-5, atol=1e-5)

    print("KERNEL_OK")
</pallas_src>

<mosaic_0001>
module attributes {stable_mosaic.version = 11 : i64} {
  func.func @kernel(%arg0: i32, %arg1: i32, %arg2: i32, %arg3: memref<3xi32, #tpu.memory_space<smem>>, %arg4: memref<3xi32, #tpu.memory_space<smem>>, %arg5: memref<16x256xf32, #tpu.memory_space<vmem>>, %arg6: memref<768x128xf32, #tpu.memory_space<vmem>>, %arg7: memref<1x1x128xf32, #tpu.memory_space<vmem>>, %arg8: memref<16x128xf32, #tpu.memory_space<vmem>>) attributes {dimension_semantics = [#tpu.dimension_semantics<parallel>, #tpu.dimension_semantics<parallel>, #tpu.dimension_semantics<arbitrary>], iteration_bounds = array<i64: 1, 3, 1>, scalar_prefetch = 2 : i64, scratch_operands = 0 : i64, tpu.core_type = #tpu.core_type<tc>, window_params = [{transform_indices = @transform_0, window_bounds = array<i64: 16, 256>}, {pipeline_mode = #tpu.pipeline_mode<synchronous>, transform_indices = @transform_1, window_bounds = array<i64: 768, 128>}, {transform_indices = @transform_2, window_bounds = array<i64: 1, 1, 128>}, {transform_indices = @transform_3, window_bounds = array<i64: 16, 128>}]} {
    %0 = arith.index_cast %arg1 : i32 to index
    %1 = memref.load %arg3[%0] : memref<3xi32, #tpu.memory_space<smem>>
    %c0_i32 = arith.constant 0 : i32
    %2 = arith.addi %1, %c0_i32 : i32
    %c256_i32 = arith.constant 256 : i32
    %3 = arith.muli %2, %c256_i32 : i32
    %4 = tpu.assume_multiple %3, 128 : i32
    %5 = arith.index_cast %4 : i32 to index
    %c0 = arith.constant 0 : index
    %6 = vector.load %arg6[%5, %c0] : memref<768x128xf32, #tpu.memory_space<vmem>>, vector<256x128xf32>
    %c0_0 = arith.constant 0 : index
    %c0_1 = arith.constant 0 : index
    %7 = vector.load %arg5[%c0_0, %c0_1] : memref<16x256xf32, #tpu.memory_space<vmem>>, vector<16x256xf32>
    %cst = arith.constant dense<0.000000e+00> : vector<16x128xf32>
    %8 = tpu.matmul %7, %6, %cst {dimension_numbers = #tpu.dot_dimension_numbers<[1], [0], [0], [1], [0, 0, 1, 1], [], []>, precision = #tpu.contract_precision<fp32>} : vector<16x256xf32>, vector<256x128xf32>, vector<16x128xf32> -> vector<16x128xf32>
    %c0_2 = arith.constant 0 : index
    %c0_3 = arith.constant 0 : index
    %c0_4 = arith.constant 0 : index
    %9 = vector.load %arg7[%c0_2, %c0_3, %c0_4] : memref<1x1x128xf32, #tpu.memory_space<vmem>>, vector<1x1x128xf32>
    %10 = vector.shape_cast %9 : vector<1x1x128xf32> to vector<1x128xf32>
    %11 = vector.broadcast %10 : vector<1x128xf32> to vector<16x128xf32>
    %12 = arith.mulf %8, %11 : vector<16x128xf32>
    %c0_5 = arith.constant 0 : index
    %c0_6 = arith.constant 0 : index
    %13 = vector.load %arg8[%c0_5, %c0_6] : memref<16x128xf32, #tpu.memory_space<vmem>>, vector<16x128xf32>
    tpu.vector_store %arg8[%c0_5, %c0_6], %12 {strides = array<i32>} : memref<16x128xf32, #tpu.memory_space<vmem>>, vector<16x128xf32>,
    return
  }
  func.func @transform_0(%arg0: i32, %arg1: i32, %arg2: i32, %arg3: memref<3xi32, #tpu.memory_space<smem>>, %arg4: memref<3xi32, #tpu.memory_space<smem>>) -> (i32, i32) {
    %0 = arith.index_cast %arg1 : i32 to index
    %1 = memref.load %arg3[%0] : memref<3xi32, #tpu.memory_space<smem>>
    %2 = arith.index_cast %arg1 : i32 to index
    %3 = memref.load %arg4[%2] : memref<3xi32, #tpu.memory_space<smem>>
    %c1_i32 = arith.constant 1 : i32
    %4 = arith.subi %3, %c1_i32 : i32
    %5 = arith.minsi %arg2, %4 : i32
    %6 = arith.addi %1, %5 : i32
    %c0_i32 = arith.constant 0 : i32
    return %arg0, %6 : i32, i32
  }
  func.func @transform_1(%arg0: i32, %arg1: i32, %arg2: i32, %arg3: memref<3xi32, #tpu.memory_space<smem>>, %arg4: memref<3xi32, #tpu.memory_space<smem>>) -> (i32, i32) {
    %c0_i32 = arith.constant 0 : i32
    %c0_i32_0 = arith.constant 0 : i32
    %c0_i32_1 = arith.constant 0 : i32
    return %c0_i32, %c0_i32_0 : i32, i32
  }
  func.func @transform_2(%arg0: i32, %arg1: i32, %arg2: i32, %arg3: memref<3xi32, #tpu.memory_space<smem>>, %arg4: memref<3xi32, #tpu.memory_space<smem>>) -> (i32, i32, i32) {
    %c0_i32 = arith.constant 0 : i32
    %c0_i32_0 = arith.constant 0 : i32
    %c0_i32_1 = arith.constant 0 : i32
    return %arg1, %c0_i32, %c0_i32_0 : i32, i32, i32
  }
  func.func @transform_3(%arg0: i32, %arg1: i32, %arg2: i32, %arg3: memref<3xi32, #tpu.memory_space<smem>>, %arg4: memref<3xi32, #tpu.memory_space<smem>>) -> (i32, i32) {
    %c0_i32 = arith.constant 0 : i32
    return %arg0, %arg1 : i32, i32
  }
}

</mosaic_0001>

<bundles_post_ra>
// kernel: tpu_custom_call.1
= control target key start
LH: loop header
LB: loop body
LE: loop exit
PB: predicated region body
PF: predicated region fallthrough
CT: control target
= control target key end

     0   :  { %s1545_s24 = smov [#allocation3]   ;;  %s1546_s25 = smov [#allocation4]   ;;  %s2374_s0 = inlined_call_operand.hbm [shape: s32[3], index: 0, kind: input, shape index: {}]   ;;  %s2375_s2 = inlined_call_operand.hbm [shape: f32[16,768], index: 2, kind: input, shape index: {}]   ;;  %s2376_s3 = inlined_call_operand.hbm [shape: f32[768,128], index: 3, kind: input, shape index: {}]   ;;  %s2377_s4 = inlined_call_operand.vmem [shape: f32[3,1,128], index: 4, kind: input, shape index: {}]   ;;  %s2378_s5 = inlined_call_operand.hbm [shape: f32[16,384], index: 5, kind: output, shape index: {}]   ;;  %s2379_s1 = inlined_call_operand.hbm [shape: s32[3], index: 1, kind: input, shape index: {}]  }
   0x1   :  { %2405 = sst [smem:[#allocation26_spill]] %s2376_s3  ;;  %s11_s20 = sshll.u32 %s2374_s0, 4  ;;  %s12_s20 = int_to_ptr.hbm [resolvable:$true] %s11_s20 }
   0x2   :  { %s16_s23 = sshll.u32 %s2379_s1, 4  ;;  %s17_s23 = int_to_ptr.hbm [resolvable:$true] %s16_s23 }
   0x3   :  { %14 = dma.hbm_to_smem %s12_s20, 16, %s1545_s24, [#allocation2] }
   0x4   :  { %19 = dma.hbm_to_smem %s17_s23, 16, %s1546_s25, [#allocation2] }
   0x5   :  { %1495 = dma.done.wait [#allocation2], 32 }
   0x6   :  { %1496 = vsyncadd [#allocation2], 4294967264 }
   0x7   :  { %22 = sfence }
   0x8   :  { %23 = vsyncpa [#allocation6], 0 }
   0x9   :  { %25 = vsyncpa [#allocation6 + $0x1], 0 }
   0xa   :  { %26 = vsyncpa [#allocation9], 0 }
   0xb   :  { %27 = vsyncpa [#allocation7], 0 }
   0xc   :  { %29 = vsyncpa [#allocation7 + $0x1], 0  ;;  %s1592_s26 = smov 0   ;;  %s1594_s0 = smov 0  }
   0xd   :  { %s1596_s27 = smov 0   ;;  %s1598_s1 = smov 0  }
   0xe   :  { %s1600_s28 = smov 0   ;;  %s1602_s29 = smov 0  }
   0xf   :  { %s1604_s30 = smov 0   ;;  %s1606_s6 = smov 0  }
  0x10   :  { %s1608_s7 = smov 0  }
  0x11 LB: > { %2406 = sst [smem:[#allocation19_spill]] %s1519_s27  ;;  %s1207_s8 = sadd.s32 4294967295, %s1543_s7   ;;  %s1543_s7 = sphi %s1608_s7, %s35_s7   ;;  %s1539_s6 = sphi %s1606_s6, %s2455_s6   ;;  %s1535_s30 = sphi %s1604_s30, %s2454_s30   ;;  %s1531_s29 = sphi %s1602_s29, %s2453_s29   ;;  %s1527_s28 = sphi %s1600_s28, %s2459_s28   ;;  %s1523_s1 = sphi %s1598_s1, %s2458_s1   ;;  %s1519_s27 = sphi %s1596_s27, %s2451_s27   ;;  %s1515_s0 = sphi %s1594_s0, %s2457_s0   ;;  %s1511_s26 = sphi %s1592_s26, %s2456_s26  }
  0x12   : > { %2407 = sst [smem:[#allocation20_spill]] %s1531_s29  ;;  %s1208_s9 = sadd.s32 4294967294, %s1543_s7  }
  0x13   : > { %2408 = sst [smem:[#allocation21_spill]] %s1539_s6  ;;  %s50_s10 = sadd.s32 1, %s1539_s6 }
  0x14   : > { %p88_p0 = scmp.ne.s32.totalorder %s1527_s28, %s1523_s1  ;;  %p52_p1 = scmp.ge.s32.totalorder %s50_s10, 3 }
  0x15   : > { %p1639_p2 = scmp.eq.s32.totalorder %s1207_s8, 0  ;;  %s150_s12 = sadd.s32 1, %s1519_s27 }
  0x16   : > { %p160_p3 = scmp.ne.s32.totalorder %s1519_s27, %s1515_s0  ;;  %s2461_s10 = smov (%p52_p1, %s50_s10), 0 }
  0x17   : > { %2410 = sst [smem:[#allocation22_spill]] %s2461_s10  ;;  %p1650_p4 = por %p1639_p2, %p88_p0 }
  0x18   : > { %p161_p5 = scmp.eq.s32.totalorder %s1207_s8, 2  ;;  %s146_s14 = ssub.s32 %s1539_s6, %s2461_s10 }
  0x19   : > { %p166_p6 = scmp.ne.s32.totalorder %s1515_s0, %s1511_s26  ;;  %p148_p7 = scmp.eq.s32.totalorder %s146_s14, 0 }
  0x1a   : > { %p1658_p8 = por %p161_p5, %p160_p3  ;;  %p167_p9 = scmp.eq.s32.totalorder %s1208_s9, 2 }
  0x1b   : > { %p1213_p10 = scmp.ge.s32.totalorder %s1543_s7, 1  ;;  %p174_p12 = scmp.lt.s32.totalorder %s1543_s7, 4 }
  0x1c   : > { %s1664_s16 = scalar_select %p148_p7, %s1519_s27, %s150_s12  }
  0x1d   : > { %p1666_p11 = por %p167_p9, %p166_p6  ;;  %s2415_s3 = sld [smem:[#allocation26_spill]] }
  0x1e   : > { %2413 = sst [smem:[#allocation23_spill]] %s1664_s16  ;;  %p1674_p13 = pnand %p1213_p10, %p174_p12 }
  0x1f   : > { %s1547_s22 = smov [#allocation8]   ;;  %s1548_s24 = smov 128  }
  0x20   : > { %p1243_p0 = pneg %p1674_p13  ;;  %s187_s23 = sshll.u32 %s1547_s22, 4  ;;  %s188_s23 = int_to_ptr.vmem [resolvable:$true] %s187_s23 }
  0x21   : > { %s1549_s25 = smov 8   ;;  %s59_s1 = sld [smem:[#allocation4 + %s1539_s6]] }
  0x22   : > { %p1244_p1 = pnand %p1243_p0, %p1639_p2  ;;  %s65_s8 = sld [smem:[#allocation4 + %s2461_s10]] }
  0x23   : > { %s185_s20 = sshll.u32 %s2415_s3, 4  ;;  %s58_s9 = sld [smem:[#allocation3 + %s1539_s6]]  ;;  %s186_s20 = int_to_ptr.hbm [resolvable:$true] %s185_s20 }
  0x24   : > { %1246 = dma.hbm_to_vmem [thread:$0]  (!%p1244_p1), %s186_s20, 12288, %s188_s23, [#allocation9], %s1548_s24, %s1548_s24, %s1549_s25  }
  0x25   : > { %p82_p3 = scmp.ne.s32.totalorder %s1531_s29, %s1527_s28  ;;  %p83_p5 = scmp.eq.s32.totalorder %s1543_s7, 0 }
  0x26   : > { %s64_s14 = sld [smem:[#allocation3 + %s2461_s10]]  ;;  %p1260_p7 = scmp.lt.s32.totalorder %s1543_s7, 3 }
  0x27   : > { %s1209_s12 = sadd.s32 4294967295, %s59_s1  ;;  %p1690_p9 = por %p83_p5, %p82_p3 }
  0x28   : > { %p1210_p6 = scmp.gt.s32.totalorder %s1209_s12, 0  ;;  %s1211_s18 = sadd.s32 4294967295, %s65_s8 }
  0x29   : > { %p1212_p10 = scmp.gt.s32.totalorder %s1211_s18, 0  ;;  %p1698_p12 = pnand %p1260_p7, %p1690_p9 }
  0x2a   : > { %s2463_s12 = smov (%p1210_p6, %s1209_s12), 0  ;;  %s75_s25 = sadd.s32 1, %s1531_s29 }
  0x2b   : > { %s63_s22 = sadd.s32 %s2463_s12, %s58_s9  ;;  %s2465_s18 = smov (%p1212_p10, %s1211_s18), 0 }
  0x2c   : > { %s69_s23 = sadd.s32 %s2465_s18, %s64_s14  ;;  %s201_s16 = sand.u32 1, %s1531_s29  }
  0x2d   : > { %s71_s24 = ssub.s32 %s63_s22, %s69_s23  ;;  %s1216_s12 = sshll.u32 %s201_s16, 5 }
  0x2e   : > { %p73_p0 = scmp.eq.s32.totalorder %s71_s24, 0  ;;  %s205_s22 = scalar_lea.vmem [#allocation5], %s1216_s12 }
  0x2f   : > { %s1234_s1 = scalar_select %p1690_p9, %s1539_s6, 0 }
  0x30   : > { %s1707_s8 = scalar_select %p73_p0, %s1531_s29, %s75_s25  }
  0x31   : > { %s1233_s3 = scalar_select %p1690_p9, [#allocation3], [#allocation11] }
  0x32   : > { %2419 = sst [smem:[#allocation24_spill]] %s1707_s8  ;;  %s2467_s1 = smov (!%p1260_p7, %s1234_s1), 0 }
  0x33   : > { %s1235_s10 = scalar_select %p1690_p9, [#allocation4], [#allocation12] }
  0x34   : > { %s2471_s3 = smov (!%p1260_p7, %s1233_s3), [#allocation13]  ;;  %s1720_s23 = sshll.u32 %s205_s22, 4  ;;  %s223_s23 = int_to_ptr.vmem [resolvable:$true] %s1720_s23 }
  0x35   : > { %s2469_s10 = smov (!%p1260_p7, %s1235_s10), [#allocation14]  ;;  %s206_s14 = sld [smem:[%s2471_s3 + %s2467_s1]] }
  0x36   : > { %s207_s9 = sld [smem:[%s2469_s10 + %s2467_s1]]  ;;  %s202_s10 = scalar_lea.sflag [#allocation6], %s201_s16 }
  0x37   : > { %p1405_p5 = pneg %p1698_p12  ;;  %s1408_s12 = scalar_lea.hbm %s2375_s2, 96 }
  0x3c   : > { %s1217_s18 = sadd.s32 4294967295, %s207_s9 }
  0x3d   : > { %p1218_p1 = scmp.gt.s32.totalorder %s1217_s18, 0 }
  0x3f   : > { %s2473_s18 = smov (%p1218_p1, %s1217_s18), 0 }
  0x40   : > { %s211_s24 = sadd.s32 %s2473_s18, %s206_s14 }
  0x41   : > { %s1230_s19 = sshll.u32 %s211_s24, 4 }
  0x42   : > { %s219_s8 = scalar_lea.hbm %s2375_s2, %s1230_s19 }
  0x43   : > { %s220_s29 = sshll.u32 %s219_s8, 4  ;;  %s221_s29 = int_to_ptr.hbm [resolvable:$true] %s220_s29 }
  0x44   : > { %s1401_s27 = sshra.s32 %s221_s29, 4  ;;  %s1402_s27 = int_to_ptr.hbm [resolvable:$true] %s1401_s27 }
  0x45   : > { %s1403_s3 = scalar_lea.hbm %s1402_s27, 32  ;;  %p1409_p9 = scmp.lt.s32.totalorder %s1402_s27, %s2375_s2 }
  0x46   : > { %p1404_p3 = scmp.ne.s32.totalorder %s1402_s27, %s1403_s3  ;;  %p1410_p10 = scmp.lt.s32.totalorder %s1408_s12, %s1403_s3 }
  0x48   : > { %p1406_p6 = pnand %p1405_p5, %p1404_p3  ;;  %p1411_p0 = por %p1410_p10, %p1409_p9 }
  0x4a   : > { %p1407_p7 = pneg %p1406_p6 }
  0x4c   : > { %p1412_p1 = pnand %p1411_p0, %p1407_p7 }
  0x4e   : > { %1415 = shalt.err (!%p1412_p1)
}
  0x4f   : > { %s1550_s6 = smov 768   ;;  %s1551_s16 = smov 256  }
  0x50   : > { %s1552_s8 = smov 16   ;;  %240 = sbr.rel (%p1674_p13) target bundleno = 359 (0x167), region = 32 }
  0x51   : > { %1254 = dma.hbm_to_vmem [thread:$0]  (!%p1698_p12), %s221_s29, 512, %s223_s23, %s202_s10, %s1550_s6, %s1551_s16, %s1552_s8  }
  0x55   : > { %s242_s22 = sand.u32 1, %s1527_s28  }
  0x56   : > { %s1222_s24 = sshll.u32 %s242_s22, 5  ;;  %s243_s19 = scalar_lea.sflag [#allocation6], %s242_s22 }
  0x57   : > { %s1739_s25 = scalar_lea.vmem [#allocation5], %s1222_s24 }
  0x58   : > { %1498 = dma.done.wait (%p1650_p4), %s243_s19, 512  }
  0x59   : > { %1500 = vsyncadd (%p1650_p4), %s243_s19, 4294966784 }
  0x5a   : > { %1502 = dma.done.wait (%p1639_p2), [#allocation9], 12288  }
  0x5b   : > { %1504 = vsyncadd (%p1639_p2), [#allocation9], 4294955008  ;;  %s290_s27 = sld [smem:[#allocation3 + %s1535_s30]]  ;;  %p286_p2 = scmp.lt.s32.totalorder %s1535_s30, 2 }
  0x5c   : > { %s275_s10 = sand.u32 1, %s1515_s0   ;;  %s1227_s12 = sshll.u32 %s1535_s30, 3 }
  0x5d   : > { %s2312_s11 = scalar_select %p286_p2, %s1535_s30, 2 }
  0x5e   : > { %s1224_s3 = sshll.u32 %s275_s10, 4  ;;  %s1095_s6 = scalar_lea.hbm %s2378_s5, %s1227_s12 }
  0x5f   : > { %s288_s23 = scalar_lea.vmem %s2377_s4, %s2312_s11  ;;  %s277_s16 = scalar_lea.vmem [#allocation10], %s1224_s3 }
  0x60   : > { %s1096_s8 = sshll.u32 %s277_s16, 4  ;;  %s1098_s22 = sshll.u32 %s1095_s6, 4  ;;  %s1097_s8 = int_to_ptr.vmem [resolvable:$true] %s1096_s8  ;;  %s1099_s22 = int_to_ptr.hbm [resolvable:$true] %s1098_s22 }
  0x61   : > { %s1225_s29 = sshll.u32 %s290_s27, 8  ;;  %s1082_s30 = scalar_lea.sflag [#allocation7], %s275_s10 }
  0x62   : > { %s1750_s21 = scalar_lea.vmem [#allocation8], %s1225_s29  ;;  %s1445_s24 = sshra.s32 %s1099_s22, 4  ;;  %s1446_s24 = int_to_ptr.hbm [resolvable:$true] %s1445_s24 }
  0x63   : > { %v308_v0 = vld [vmem:[%s1750_s21 + $0x78] sm:$0xff]  ;;  %v307_v1 = vld [vmem:[%s1750_s21 + $0x70] sm:$0xff]  ;;  %v306_v2 = vld [vmem:[%s1750_s21 + $0x68] sm:$0xff]  ;;  %s1447_s19 = scalar_lea.hbm %s1446_s24, 16  ;;  %s1451_s29 = scalar_lea.hbm %s2378_s5, 48 }
  0x64   : > { %v1755_v3 = vand.u32 4294901760, %v308_v0  ;;  %v1757_v4 = vand.u32 4294901760, %v307_v1  ;;  %v1759_v5 = vand.u32 4294901760, %v306_v2  ;;  %v305_v6 = vld [vmem:[%s1750_s21 + $0x60] sm:$0xff]  ;;  %v304_v7 = vld [vmem:[%s1750_s21 + $0x58] sm:$0xff]  ;;  %v303_v8 = vld [vmem:[%s1750_s21 + $0x50] sm:$0xff]  ;;  %p1448_p4 = scmp.ne.s32.totalorder %s1446_s24, %s1447_s19  ;;  %p1452_p3 = scmp.lt.s32.totalorder %s1446_s24, %s2378_s5 }
  0x65   : > { %v1764_v9 = vand.u32 4294901760, %v305_v6  ;;  %v1766_v10 = vand.u32 4294901760, %v304_v7  ;;  %v1768_v11 = vand.u32 4294901760, %v303_v8  ;;  %v302_v12 = vld [vmem:[%s1750_s21 + $0x48] sm:$0xff]  ;;  %v301_v13 = vld [vmem:[%s1750_s21 + $0x40] sm:$0xff]  ;;  %v300_v18 = vld [vmem:[%s1750_s21 + $0x38] sm:$0xff]  ;;  %p1453_p5 = scmp.lt.s32.totalorder %s1451_s29, %s1447_s19 }
  0x66   : > { %330 = vmatpush.msra.mxu0 %v1755_v3  ;;  %v1774_v14 = vsub.f32 %v308_v0, %v1755_v3  ;;  %v1777_v15 = vsub.f32 %v307_v1, %v1757_v4  ;;  %543 = vmatpush.msra.mxu3 %v1755_v3  ;;  %v1781_v16 = vsub.f32 %v306_v2, %v1759_v5  ;;  %v1783_v17 = vand.u32 4294901760, %v302_v12  ;;  %v299_v26 = vld [vmem:[%s1750_s21 + $0x30] sm:$0xff]  ;;  %v298_v36 = vld [vmem:[%s1750_s21 + $0x28] sm:$0xff]  ;;  %v297_v42 = vld [vmem:[%s1750_s21 + $0x20] sm:$0xff]  ;;  %p1449_p13 = pnand %p1448_p4, %p1658_p8 }
  0x67   : > { %v1787_v19 = vsub.f32 %v305_v6, %v1764_v9  ;;  %v1790_v20 = vsub.f32 %v304_v7, %v1766_v10  ;;  %v1793_v21 = vsub.f32 %v303_v8, %v1768_v11  ;;  %v1800_v25 = vand.u32 4294901760, %v301_v13  ;;  %v296_v48 = vld [vmem:[%s1750_s21 + $0x18] sm:$0xff]  ;;  %v295_v54 = vld [vmem:[%s1750_s21 + $0x10] sm:$0xff]  ;;  %v294_v61 = vld [vmem:[%s1750_s21 + $0x8] sm:$0xff]  ;;  %p1454_p6 = por %p1453_p5, %p1452_p3 }
  0x68   : > { %332 = vmatpush.msra.mxu0 %v1757_v4  ;;  %485 = vmatpush.msra.mxu2 %v1774_v14  ;;  %v380_v22 = vand.u32 4294901760, %v1774_v14  ;;  %v386_v23 = vand.u32 4294901760, %v1777_v15  ;;  %v2397_v24 = vand.u32 4294901760, %v1781_v16  ;;  %v1805_v28 = vand.u32 4294901760, %v300_v18  ;;  %v324_v59 = vld [vmem:[%s1750_s21 + $0xf8] sm:$0xff]  ;;  %v293_v2 = vld [vmem:[%s1750_s21] sm:$0xff]  ;;  %p1450_p12 = pneg %p1449_p13 }
  0x69   : > { %545 = vmatpush.msra.mxu3 %v1757_v4  ;;  %v2396_v27 = vand.u32 4294901760, %v1787_v19  ;;  %v1808_v29 = vsub.f32 %v302_v12, %v1783_v17  ;;  %v2393_v33 = vand.u32 4294901760, %v1790_v20  ;;  %v1823_v34 = vand.u32 4294901760, %v299_v26  ;;  %v323_v6 = vld [vmem:[%s1750_s21 + $0xf0] sm:$0xff] }
  0x6a   : > { %334 = vmatpush.msra.mxu0 %v1759_v5  ;;  %488 = vmatpush.msra.mxu2 %v1777_v15  ;;  %v381_v30 = vsub.f32 %v1774_v14, %v380_v22  ;;  %v387_v31 = vsub.f32 %v1777_v15, %v386_v23  ;;  %v393_v32 = vsub.f32 %v1781_v16, %v2397_v24  ;;  %v2392_v35 = vand.u32 4294901760, %v1793_v21  ;;  %p1455_p7 = pnand %p1454_p6, %p1450_p12 }
  0x6b   : > { %547 = vmatpush.msra.mxu3 %v1759_v5  ;;  %v399_v39 = vsub.f32 %v1787_v19, %v2396_v27  ;;  %v1833_v40 = vsub.f32 %v301_v13, %v1800_v25  ;;  %v2390_v41 = vand.u32 4294901760, %v1808_v29  ;;  %v405_v44 = vsub.f32 %v1790_v20, %v2393_v33 }
  0x6c   : > { %336 = vmatpush.msra.mxu0 %v1764_v9  ;;  %v382_v37 = vand.u32 4294901760, %v381_v30  ;;  %491 = vmatpush.msra.mxu2 %v1781_v16  ;;  %v388_v38 = vand.u32 4294901760, %v387_v31  ;;  %v394_v43 = vand.u32 4294901760, %v393_v32  ;;  %v1842_v45 = vand.u32 4294901760, %v298_v36  ;;  %v322_v30 = vld [vmem:[%s1750_s21 + $0xe8] sm:$0xff] }
  0x6d   : > { %549 = vmatpush.msra.mxu3 %v1764_v9  ;;  %v1845_v46 = vsub.f32 %v300_v18, %v1805_v28  ;;  %v411_v47 = vsub.f32 %v1793_v21, %v2392_v35  ;;  %v400_v49 = vand.u32 4294901760, %v399_v39  ;;  %v1854_v50 = vand.u32 4294901760, %v297_v42 }
  0x6e   : > { %338 = vmatpush.msra.mxu0 %v1766_v10  ;;  %383 = vmatpush.msra.mxu1 %v382_v37  ;;  %v2389_v51 = vand.u32 4294901760, %v1833_v40  ;;  %v1858_v52 = vsub.f32 %v299_v26, %v1823_v34  ;;  %v417_v53 = vsub.f32 %v1808_v29, %v2390_v41  ;;  %v406_v55 = vand.u32 4294901760, %v405_v44  ;;  %v321_v44 = vld [vmem:[%s1750_s21 + $0xe0] sm:$0xff] }
  0x6f   : > { %494 = vmatpush.msra.mxu2 %v1787_v19  ;;  %551 = vmatpush.msra.mxu3 %v1766_v10  ;;  %v1867_v56 = vand.u32 4294901760, %v296_v48  ;;  %v2387_v57 = vand.u32 4294901760, %v1845_v46  ;;  %v1871_v58 = vsub.f32 %v298_v36, %v1842_v45  ;;  %v412_v60 = vand.u32 4294901760, %v411_v47 }
  0x70   : > { %340 = vmatpush.msra.mxu0 %v1768_v11  ;;  %389 = vmatpush.msra.mxu1 %v388_v38  ;;  %v423_v62 = vsub.f32 %v1833_v40, %v2389_v51  ;;  %v1881_v63 = vand.u32 4294901760, %v295_v54  ;;  %v2386_v0 = vand.u32 4294901760, %v1858_v52  ;;  %v1885_v1 = vsub.f32 %v297_v42, %v1854_v50 }
  0x71   : > { %497 = vmatpush.msra.mxu2 %v1790_v20  ;;  %553 = vmatpush.msra.mxu3 %v1768_v11  ;;  %v418_v7 = vand.u32 4294901760, %v417_v53  ;;  %v1891_v8 = vand.u32 4294901760, %v324_v59  ;;  %v429_v12 = vsub.f32 %v1845_v46, %v2387_v57  ;;  %v1897_v13 = vand.u32 4294901760, %v294_v61  ;;  %v318_v57 = vld [vmem:[%s1750_s21 + $0xc8] sm:$0xff] }
  0x72   : > { %342 = vmatpush.msra.mxu0 %v1783_v17  ;;  %395 = vmatpush.msra.mxu1 %v394_v43  ;;  %v2385_v18 = vand.u32 4294901760, %v1871_v58  ;;  %v1901_v26 = vsub.f32 %v296_v48, %v1867_v56  ;;  %v1906_v31 = vand.u32 4294901760, %v293_v2  ;;  %v1908_v32 = vand.u32 4294901760, %v323_v6 }
  0x73   : > { %500 = vmatpush.msra.mxu2 %v1793_v21  ;;  %555 = vmatpush.msra.mxu3 %v1783_v17  ;;  %v424_v36 = vand.u32 4294901760, %v423_v62  ;;  %v435_v37 = vsub.f32 %v1858_v52, %v2386_v0  ;;  %v2384_v38 = vand.u32 4294901760, %v1885_v1  ;;  %v1916_v39 = vsub.f32 %v295_v54, %v1881_v63 }
  0x74   : > { %344 = vmatpush.msra.mxu0 %v1800_v25  ;;  %401 = vmatpush.msra.mxu1 %v400_v49  ;;  %2420 = vst [vmem:[#allocation25_spill] sm:$0xff] %v1906_v31  ;;  %v1921_v42 = vsub.f32 %v324_v59, %v1891_v8  ;;  %v1923_v43 = vand.u32 4294901760, %v322_v30  ;;  %v430_v47 = vand.u32 4294901760, %v429_v12  ;;  %v441_v48 = vsub.f32 %v1871_v58, %v2385_v18  ;;  %v320_v59 = vld [vmem:[%s1750_s21 + $0xd8] sm:$0xff]  ;;  %v319_v12 = vld [vmem:[%s1750_s21 + $0xd0] sm:$0xff] }
  0x75   : > { %503 = vmatpush.msra.mxu2 %v1808_v29  ;;  %557 = vmatpush.msra.mxu3 %v1800_v25  ;;  %v2388_v49 = vand.u32 4294901760, %v1901_v26  ;;  %v1932_v53 = vsub.f32 %v294_v61, %v1897_v13  ;;  %v1937_v54 = vsub.f32 %v293_v2, %v1906_v31  ;;  %v447_v61 = vsub.f32 %v1885_v1, %v2384_v38 }
  0x76   : > { %346 = vmatpush.msra.mxu0 %v1805_v28  ;;  %407 = vmatpush.msra.mxu1 %v406_v55  ;;  %v1940_v55 = vsub.f32 %v323_v6, %v1908_v32  ;;  %v2391_v62 = vand.u32 4294901760, %v1916_v39  ;;  %v2394_v2 = vand.u32 4294901760, %v1921_v42  ;;  %v1954_v6 = vsub.f32 %v322_v30, %v1923_v43 }
  0x77   : > { %506 = vmatpush.msra.mxu2 %v1833_v40  ;;  %559 = vmatpush.msra.mxu3 %v1805_v28  ;;  %v2395_v38 = vand.u32 4294901760, %v1932_v53  ;;  %v1962_v18 = vand.u32 4294901760, %v320_v59  ;;  %v2398_v30 = vand.u32 4294901760, %v1937_v54  ;;  %v1976_v51 = vand.u32 4294901760, %v319_v12 }
  0x78   : > { %348 = vmatpush.msra.mxu0 %v1823_v34  ;;  %413 = vmatpush.msra.mxu1 %v412_v60  ;;  %v436_v60 = vand.u32 4294901760, %v435_v37  ;;  %v453_v37 = vsub.f32 %v1901_v26, %v2388_v49  ;;  %v2399_v0 = vand.u32 4294901760, %v1940_v55  ;;  %v753_v41 = vsub.f32 %v1921_v42, %v2394_v2 }
  0x79   : > { %509 = vmatpush.msra.mxu2 %v1845_v46  ;;  %561 = vmatpush.msra.mxu3 %v1823_v34  ;;  %v1990_v35 = vsub.f32 %v320_v59, %v1962_v18  ;;  %v1992_v33 = vand.u32 4294901760, %v318_v57  ;;  %v471_v2 = vsub.f32 %v1937_v54, %v2398_v30  ;;  %v2006_v27 = vsub.f32 %v319_v12, %v1976_v51 }
  0x7a   : > { %350 = vmatpush.msra.mxu0 %v1842_v45  ;;  %419 = vmatpush.msra.mxu1 %v418_v7  ;;  %v1948_v7 = vand.u32 4294901760, %v321_v44  ;;  %v754_v30 = vand.u32 4294901760, %v753_v41 }
  0x7b   : > { %512 = vmatpush.msra.mxu2 %v1858_v52  ;;  %563 = vmatpush.msra.mxu3 %v1842_v45 }
  0x7c   : > { %352 = vmatpush.msra.mxu0 %v1854_v50  ;;  %425 = vmatpush.msra.mxu1 %v424_v36  ;;  %v442_v36 = vand.u32 4294901760, %v441_v48  ;;  %v459_v48 = vsub.f32 %v1916_v39, %v2391_v62  ;;  %v1974_v49 = vsub.f32 %v321_v44, %v1948_v7  ;;  %v454_v62 = vand.u32 4294901760, %v453_v37  ;;  %v316_v37 = vld [vmem:[%s1750_s21 + $0xb8] sm:$0xff] }
  0x7d   : > { %515 = vmatpush.msra.mxu2 %v1871_v58  ;;  %565 = vmatpush.msra.mxu3 %v1854_v50  ;;  %v465_v44 = vsub.f32 %v1932_v53, %v2395_v38  ;;  %v2020_v38 = vsub.f32 %v318_v57, %v1992_v33  ;;  %v2022_v14 = vand.u32 4294901760, %v316_v37 }
  0x7e   : > { %354 = vmatpush.msra.mxu0 %v1867_v56  ;;  %431 = vmatpush.msra.mxu1 %v430_v47  ;;  %v448_v47 = vand.u32 4294901760, %v447_v61  ;;  %v317_v61 = vld [vmem:[%s1750_s21 + $0xc0] sm:$0xff]  ;;  %v460_v59 = vand.u32 4294901760, %v459_v48 }
  0x7f   : > { %518 = vmatpush.msra.mxu2 %v1885_v1  ;;  %567 = vmatpush.msra.mxu3 %v1867_v56  ;;  %v2008_v24 = vand.u32 4294901760, %v317_v61  ;;  %v466_v48 = vand.u32 4294901760, %v465_v44 }
  0x80   : > { %356 = vmatpush.msra.mxu0 %v1881_v63  ;;  %437 = vmatpush.msra.mxu1 %v436_v60  ;;  %v2400_v60 = vand.u32 4294901760, %v1954_v6 }
  0x81   : > { %521 = vmatpush.msra.mxu2 %v1901_v26  ;;  %569 = vmatpush.msra.mxu3 %v1881_v63  ;;  %v2034_v12 = vsub.f32 %v317_v61, %v2008_v24  ;;  %v2046_v61 = vsub.f32 %v316_v37, %v2022_v14 }
  0x82   : > { %358 = vmatpush.msra.mxu0 %v1897_v13  ;;  %443 = vmatpush.msra.mxu1 %v442_v36  ;;  %v759_v36 = vsub.f32 %v1940_v55, %v2399_v0  ;;  %v765_v0 = vsub.f32 %v1954_v6, %v2400_v60  ;;  %v325_v60 = vld [vmem:[%s1739_s25] sm:$0xff] }
  0x83   : > { %524 = vmatpush.msra.mxu2 %v1916_v39  ;;  %571 = vmatpush.msra.mxu3 %v1897_v13  ;;  %v2048_v57 = vand.u32 4294901760, %v325_v60 }
  0x84   : > { %360 = vmatpush.msra.mxu0 %v1906_v31  ;;  %449 = vmatpush.msra.mxu1 %v448_v47  ;;  %v315_v47 = vld [vmem:[%s1750_s21 + $0xb0] sm:$0xff]  ;;  %v760_v41 = vand.u32 4294901760, %v759_v36  ;;  %v2423_v36 = vand.u32 4294901760, %v1990_v35 }
  0x85   : > { %527 = vmatpush.msra.mxu2 %v1932_v53  ;;  %573 = vmatpush.msra.mxu3 %v1906_v31  ;;  %v2036_v15 = vand.u32 4294901760, %v315_v47  ;;  %v314_v31 = vld [vmem:[%s1750_s21 + $0xa8] sm:$0xff] }
  0x86   : > { %590 = vmatpush.msrb.mxu0 %v380_v22  ;;  %455 = vmatpush.msra.mxu1 %v454_v62  ;;  %v472_v22 = vand.u32 4294901760, %v471_v2  ;;  %v2421_v62 = vand.u32 4294901760, %v1974_v49  ;;  %v766_v2 = vand.u32 4294901760, %v765_v0 }
  0x87   : > { %530 = vmatpush.msra.mxu2 %v1937_v54  ;;  %755 = vmatpush.msrb.mxu3 %v754_v30  ;;  %v2425_v30 = vand.u32 4294901760, %v2006_v27  ;;  %v2059_v37 = vsub.f32 %v315_v47, %v2036_v15  ;;  %v2402_v47 = vand.u32 4294901760, %v2046_v61 }
  0x88   : > { %594 = vmatpush.msrb.mxu0 %v386_v23  ;;  %461 = vmatpush.msra.mxu1 %v460_v59  ;;  %v771_v44 = vsub.f32 %v1974_v49, %v2421_v62  ;;  %v2422_v23 = vand.u32 4294901760, %v1781_v16  ;;  %v777_v59 = vsub.f32 %v1990_v35, %v2423_v36  ;;  %v2424_v16 = vand.u32 4294901760, %v1787_v19  ;;  %v313_v36 = vld [vmem:[%s1750_s21 + $0xa0] sm:$0xff] }
  0x89   : > { %702 = vmatpush.msrb.mxu2 %v1891_v8  ;;  %761 = vmatpush.msrb.mxu3 %v760_v41  ;;  %v2426_v62 = vand.u32 4294901760, %v1790_v20  ;;  %v2065_v19 = vand.u32 4294901760, %v314_v31  ;;  %v2427_v41 = vand.u32 4294901760, %v2020_v38  ;;  %v312_v20 = vld [vmem:[%s1750_s21 + $0x98] sm:$0xff] }
  0x8a   : > { %598 = vmatpush.msrb.mxu0 %v2422_v23  ;;  %467 = vmatpush.msra.mxu1 %v466_v48  ;;  %v772_v0 = vand.u32 4294901760, %v771_v44  ;;  %v783_v48 = vsub.f32 %v2006_v27, %v2425_v30  ;;  %v2404_v23 = vand.u32 4294901760, %v2034_v12  ;;  %v2429_v30 = vand.u32 4294901760, %v1808_v29 }
  0x8b   : > { %704 = vmatpush.msrb.mxu2 %v1908_v32  ;;  %767 = vmatpush.msrb.mxu3 %v766_v2  ;;  %v789_v44 = vsub.f32 %v2020_v38, %v2427_v41  ;;  %v311_v41 = vld [vmem:[%s1750_s21 + $0x90] sm:$0xff] }
  0x8c   : > { %602 = vmatpush.msrb.mxu0 %v2424_v16  ;;  %473 = vmatpush.msra.mxu1 %v472_v22  ;;  %v778_v22 = vand.u32 4294901760, %v777_v59  ;;  %v2073_v16 = vsub.f32 %v325_v60, %v2048_v57  ;;  %v784_v2 = vand.u32 4294901760, %v783_v48  ;;  %v795_v59 = vsub.f32 %v2034_v12, %v2404_v23 }
  0x8d   : > { %706 = vmatpush.msrb.mxu2 %v1923_v43  ;;  %773 = vmatpush.msrb.mxu3 %v772_v0  ;;  %v2403_v60 = vand.u32 4294901760, %v2059_v37  ;;  %v790_v0 = vand.u32 4294901760, %v789_v44  ;;  %v801_v48 = vsub.f32 %v2046_v61, %v2402_v47  ;;  %v310_v47 = vld [vmem:[%s1750_s21 + $0x88] sm:$0xff]  ;;  %v2432_v23 = vand.u32 4294901760, %v1858_v52 }
  0x8e   : > { %606 = vmatpush.msrb.mxu0 %v2426_v62  ;;  %661 = vmatpush.msrb.mxu1 %v1755_v3  ;;  %v2428_v62 = vand.u32 4294901760, %v1793_v21  ;;  %v2079_v3 = vand.u32 4294901760, %v313_v36  ;;  %v2092_v21 = vand.u32 4294901760, %v312_v20  ;;  %v363_v29 = vand.u32 4294901760, %v2073_v16 }
  0x8f   : > { %708 = vmatpush.msrb.mxu2 %v1948_v7  ;;  %779 = vmatpush.msrb.mxu3 %v778_v22  ;;  %v796_v22 = vand.u32 4294901760, %v795_v59  ;;  %v807_v44 = vsub.f32 %v2059_v37, %v2403_v60  ;;  %v309_v60 = vld [vmem:[%s1750_s21 + $0x80] sm:$0xff] }
  0x90   : > { %610 = vmatpush.msrb.mxu0 %v2428_v62  ;;  %663 = vmatpush.msrb.mxu1 %v1757_v4  ;;  %v2090_v4 = vsub.f32 %v314_v31, %v2065_v19  ;;  %v327_v62 = vld [vmem:[%s1739_s25 + $0x10] sm:$0xff]  ;;  %v2105_v31 = vsub.f32 %v313_v36, %v2079_v3  ;;  %v2119_v36 = vsub.f32 %v312_v20, %v2092_v21 }
  0x91   : > { %710 = vmatpush.msrb.mxu2 %v1962_v18  ;;  %785 = vmatpush.msrb.mxu3 %v784_v2  ;;  %v802_v2 = vand.u32 4294901760, %v801_v48  ;;  %v364_v59 = vsub.f32 %v2073_v16, %v363_v29  ;;  %v808_v20 = vand.u32 4294901760, %v807_v44  ;;  %v2433_v48 = vand.u32 4294901760, %v1871_v58  ;;  %v326_v44 = vld [vmem:[%s1739_s25 + $0x8] sm:$0xff] }
  0x92   : > { %614 = vmatpush.msrb.mxu0 %v2429_v30  ;;  %665 = vmatpush.msrb.mxu1 %v1759_v5  ;;  %v2430_v5 = vand.u32 4294901760, %v1833_v40  ;;  %v2111_v30 = vand.u32 4294901760, %v311_v41  ;;  %v2431_v40 = vand.u32 4294901760, %v1845_v46  ;;  %v2130_v46 = vand.u32 4294901760, %v310_v47 }
  0x93   : > { %712 = vmatpush.msrb.mxu2 %v1976_v51  ;;  %791 = vmatpush.msrb.mxu3 %v790_v0  ;;  %v824_v52 = vand.u32 4294901760, %v2119_v36 }
  0x94   : > { %618 = vmatpush.msrb.mxu0 %v2430_v5  ;;  %667 = vmatpush.msrb.mxu1 %v1764_v9  ;;  %v812_v9 = vand.u32 4294901760, %v2090_v4  ;;  %v2121_v5 = vand.u32 4294901760, %v327_v62  ;;  %v2134_v0 = vsub.f32 %v311_v41, %v2111_v30  ;;  %v365_v41 = vand.u32 4294901760, %v364_v59 }
  0x95   : > { %714 = vmatpush.msrb.mxu2 %v1992_v33  ;;  %797 = vmatpush.msrb.mxu3 %v796_v22  ;;  %v2434_v22 = vand.u32 4294901760, %v1885_v1  ;;  %v2154_v58 = vsub.f32 %v310_v47, %v2130_v46 }
  0x96   : > { %622 = vmatpush.msrb.mxu0 %v2431_v40  ;;  %669 = vmatpush.msrb.mxu1 %v1766_v10  ;;  %v818_v10 = vand.u32 4294901760, %v2105_v31  ;;  %v2144_v40 = vand.u32 4294901760, %v309_v60 }
  0x97   : > { %716 = vmatpush.msrb.mxu2 %v2008_v24  ;;  %803 = vmatpush.msrb.mxu3 %v802_v2  ;;  %v2435_v2 = vand.u32 4294901760, %v1901_v26  ;;  %v2436_v26 = vand.u32 4294901760, %v1916_v39 }
  0x98   : > { %626 = vmatpush.msrb.mxu0 %v2432_v23  ;;  %671 = vmatpush.msrb.mxu1 %v1768_v11  ;;  %v813_v11 = vsub.f32 %v2090_v4, %v812_v9  ;;  %v370_v23 = vsub.f32 %v327_v62, %v2121_v5  ;;  %v830_v62 = vand.u32 4294901760, %v2134_v0  ;;  %v2166_v47 = vsub.f32 %v309_v60, %v2144_v40 }
  0x99   : > { %718 = vmatpush.msrb.mxu2 %v2022_v14  ;;  %809 = vmatpush.msrb.mxu3 %v808_v20 }
  0x9a   : > { %630 = vmatpush.msrb.mxu0 %v2433_v48  ;;  %673 = vmatpush.msrb.mxu1 %v1783_v17  ;;  %v819_v17 = vsub.f32 %v2105_v31, %v818_v10  ;;  %v814_v1 = vand.u32 4294901760, %v813_v11  ;;  %v371_v59 = vand.u32 4294901760, %v370_v23  ;;  %v831_v60 = vsub.f32 %v2134_v0, %v830_v62 }
  0x9b   : > { %720 = vmatpush.msrb.mxu2 %v2036_v15  ;;  %366 = vmatmul.f32.vlgmr.msra.gmra.mxu0 %v365_v41  ;;  %v842_v39 = vand.u32 4294901760, %v2166_v47  ;;  %v2437_v11 = vand.u32 4294901760, %v1932_v53 }
  0x9c   : > { %634 = vmatpush.msrb.mxu0 %v2434_v22  ;;  %675 = vmatpush.msrb.mxu1 %v1800_v25  ;;  %v825_v25 = vsub.f32 %v2119_v36, %v824_v52  ;;  %v820_v20 = vand.u32 4294901760, %v819_v17  ;;  %v2438_v22 = vand.u32 4294901760, %v1937_v54  ;;  %v832_v17 = vand.u32 4294901760, %v831_v60 }
  0x9d   : > { %533 = vmatmul.f32.vlgmr.msra.gmra.mxu2 %v2073_v16  ;;  %v2169_v16 = vand.u32 4294901760, %v326_v44  ;;  %577 = vmatmul.f32.vlgmr.msra.gmra.mxu3 %v363_v29  ;;  %v372_v29 = vsub.f32 %v370_v23, %v371_v59  ;;  %v843_v53 = vsub.f32 %v2166_v47, %v842_v39 }
  0x9e   : > { %638 = vmatpush.msrb.mxu0 %v2435_v2  ;;  %677 = vmatpush.msrb.mxu1 %v1805_v28  ;;  %v836_v28 = vand.u32 4294901760, %v2154_v58  ;;  %v826_v48 = vand.u32 4294901760, %v825_v25 }
  0x9f   : > { %722 = vmatpush.msrb.mxu2 %v2065_v19  ;;  %815 = vmatpush.msrb.mxu3 %v814_v1  ;;  %v844_v1 = vand.u32 4294901760, %v843_v53 }
  0xa0   : > { %642 = vmatpush.msrb.mxu0 %v2436_v26  ;;  %679 = vmatpush.msrb.mxu1 %v1823_v34  ;;  %v2185_v34 = vsub.f32 %v326_v44, %v2169_v16  ;;  %v837_v41 = vsub.f32 %v2154_v58, %v836_v28  ;;  %v328_v44 = vld [vmem:[%s1739_s25 + $0x18] sm:$0xff]  ;;  %v2441_v26 = vld [vmem:[#allocation25_spill] sm:$0xff] }
  0xa1   : > { %724 = vmatpush.msrb.mxu2 %v2079_v3  ;;  %475 = vmatmul.f32.vlgmr.msra.gmra.mxu1 %v2048_v57  ;;  %v2204_v54 = vand.u32 4294901760, %v328_v44 }
  0xa2   : > { %646 = vmatpush.msrb.mxu0 %v2437_v11  ;;  %681 = vmatpush.msrb.mxu1 %v1842_v45  ;;  %v373_v45 = vand.u32 4294901760, %v372_v29  ;;  %v735_v2 = vand.u32 4294901760, %v2185_v34 }
  0xa3   : > { %726 = vmatpush.msrb.mxu2 %v2092_v21  ;;  %821 = vmatpush.msrb.mxu3 %v820_v20  ;;  %v2216_v25 = vsub.f32 %v328_v44, %v2204_v54  ;;  %v2442_v20 = vand.u32 4294901760, %v1954_v6 }
  0xa4   : > { %650 = vmatpush.msrb.mxu0 %v2438_v22  ;;  %683 = vmatpush.msrb.mxu1 %v1854_v50  ;;  %v838_v50 = vand.u32 4294901760, %v837_v41 }
  0xa5   : > { %728 = vmatpush.msrb.mxu2 %v2111_v30  ;;  %827 = vmatpush.msrb.mxu3 %v826_v48 }
  0xa6   : > { %857 = vmatpush.msra.mxu0 %v1921_v42  ;;  %538 = vmatmul.f32.gmra.mxu2 %v370_v23  ;;  %v736_v23 = vsub.f32 %v2185_v34, %v735_v2 }
  0xa7   : > { %685 = vmatpush.msrb.mxu1 %v1867_v56  ;;  %730 = vmatpush.msrb.mxu2 %v2130_v46  ;;  %v2439_v56 = vand.u32 4294901760, %v1921_v42  ;;  %v743_v42 = vand.u32 4294901760, %v2216_v25 }
  0xa8   : > { %833 = vmatpush.msrb.mxu3 %v832_v17  ;;  %860 = vmatpush.msra.mxu0 %v1940_v55 }
  0xa9   : > { %374 = vmatmul.f32.gmra.mxu0 %v373_v45  ;;  %583 = vmatmul.f32.gmra.mxu3 %v371_v59  ;;  %v737_v59 = vand.u32 4294901760, %v736_v23 }
  0xaa   : > { %687 = vmatpush.msrb.mxu1 %v1881_v63  ;;  %732 = vmatpush.msrb.mxu2 %v2144_v40  ;;  %v2440_v63 = vand.u32 4294901760, %v1940_v55  ;;  %v2444_v55 = vand.u32 4294901760, %v1990_v35 }
  0xab   : > { %839 = vmatpush.msrb.mxu3 %v838_v50  ;;  %863 = vmatpush.msra.mxu0 %v1954_v6 }
  0xac   : > { %962 = vmatpush.msra.mxu2 %v2439_v56  ;;  %479 = vmatmul.f32.gmra.mxu1 %v2121_v5 }
  0xad   : > { %689 = vmatpush.msrb.mxu1 %v1897_v13  ;;  %845 = vmatpush.msrb.mxu3 %v844_v1  ;;  %v2443_v13 = vand.u32 4294901760, %v1974_v49 }
  0xae   : > { %866 = vmatpush.msra.mxu0 %v1974_v49  ;;  %966 = vmatpush.msra.mxu2 %v2440_v63  ;;  %v2445_v49 = vand.u32 4294901760, %v2006_v27 }
  0xaf   : > { %1033 = vmatpush.msra.mxu3 %v1891_v8  ;;  %691 = vmatpush.msrb.mxu1 %v2441_v26 }
  0xb0   : > { %869 = vmatpush.msra.mxu0 %v1990_v35  ;;  %970 = vmatpush.msra.mxu2 %v2442_v20  ;;  %v2446_v35 = vand.u32 4294901760, %v2020_v38 }
  0xb1   : > { %915 = vmatpush.msra.mxu1 %v1891_v8  ;;  %1035 = vmatpush.msra.mxu3 %v1908_v32  ;;  %v744_v8 = vsub.f32 %v2216_v25, %v743_v42 }
  0xb2   : > { %738 = vmatmul.f32.vlgmr.msrb.gmra.mxu2 %v737_v59  ;;  %872 = vmatpush.msra.mxu0 %v2006_v27  ;;  %v2448_v27 = vand.u32 4294901760, %v2046_v61 }
  0xb3   : > { %917 = vmatpush.msra.mxu1 %v1908_v32  ;;  %974 = vmatpush.msra.mxu2 %v2443_v13  ;;  %v745_v32 = vand.u32 4294901760, %v744_v8 }
  0xb4   : > { %1037 = vmatpush.msra.mxu3 %v1923_v43  ;;  %652 = vmatmul.f32.vlgmr.msrb.gmra.mxu0 %v2048_v57 }
  0xb5   : > { %847 = vmatmul.f32.vlgmr.msrb.gmra.mxu3 %v2169_v16  ;;  %875 = vmatpush.msra.mxu0 %v2020_v38 }
  0xb6   : > { %919 = vmatpush.msra.mxu1 %v1923_v43  ;;  %978 = vmatpush.msra.mxu2 %v2444_v55  ;;  %v2447_v43 = vand.u32 4294901760, %v2034_v12 }
  0xb7   : > { %1039 = vmatpush.msra.mxu3 %v1948_v7  ;;  %693 = vmatmul.f32.vlgmr.msrb.gmra.mxu1 %v2048_v57 }
  0xb8   : > { %878 = vmatpush.msra.mxu0 %v2034_v12  ;;  %921 = vmatpush.msra.mxu1 %v1948_v7 }
  0xb9   : > { %982 = vmatpush.msra.mxu2 %v2445_v49  ;;  %1041 = vmatpush.msra.mxu3 %v1962_v18 }
  0xba   : > { %881 = vmatpush.msra.mxu0 %v2046_v61  ;;  %923 = vmatpush.msra.mxu1 %v1962_v18 }
  0xbb   : > { %986 = vmatpush.msra.mxu2 %v2446_v35  ;;  %1043 = vmatpush.msra.mxu3 %v1976_v51 }
  0xbc   : > { %746 = vmatmul.f32.gmra.mxu2 %v745_v32  ;;  %884 = vmatpush.msra.mxu0 %v2059_v37 }
  0xbd   : > { %925 = vmatpush.msra.mxu1 %v1976_v51  ;;  %990 = vmatpush.msra.mxu2 %v2447_v43  ;;  %v2449_v51 = vand.u32 4294901760, %v2059_v37 }
  0xbe   : > { %1045 = vmatpush.msra.mxu3 %v1992_v33  ;;  %656 = vmatmul.f32.gmra.mxu0 %v2121_v5 }
  0xbf   : > { %851 = vmatmul.f32.gmra.mxu3 %v2204_v54  ;;  %887 = vmatpush.msra.mxu0 %v2090_v4 }
  0xc0   : > { %927 = vmatpush.msra.mxu1 %v1992_v33  ;;  %994 = vmatpush.msra.mxu2 %v2448_v27 }
  0xc1   : > { %1047 = vmatpush.msra.mxu3 %v2008_v24  ;;  %697 = vmatmul.f32.gmra.mxu1 %v2121_v5 }
  0xc2   : > { %890 = vmatpush.msra.mxu0 %v2105_v31  ;;  %929 = vmatpush.msra.mxu1 %v2008_v24 }
  0xc3   : > { %998 = vmatpush.msra.mxu2 %v2449_v51  ;;  %1049 = vmatpush.msra.mxu3 %v2022_v14 }
  0xc4   : > { %893 = vmatpush.msra.mxu0 %v2119_v36  ;;  %931 = vmatpush.msra.mxu1 %v2022_v14 }
  0xc5   : > { %1002 = vmatpush.msra.mxu2 %v812_v9  ;;  %1051 = vmatpush.msra.mxu3 %v2036_v15 }
  0xc6   : > { %896 = vmatpush.msra.mxu0 %v2134_v0  ;;  %933 = vmatpush.msra.mxu1 %v2036_v15 }
  0xc7   : > { %1006 = vmatpush.msra.mxu2 %v818_v10  ;;  %1053 = vmatpush.msra.mxu3 %v2065_v19 }
  0xc8   : > { %899 = vmatpush.msra.mxu0 %v2154_v58  ;;  %935 = vmatpush.msra.mxu1 %v2065_v19 }
  0xc9   : > { %1010 = vmatpush.msra.mxu2 %v824_v52  ;;  %1055 = vmatpush.msra.mxu3 %v2079_v3 }
  0xca   : > { %902 = vmatpush.msra.mxu0 %v2166_v47  ;;  %937 = vmatpush.msra.mxu1 %v2079_v3 }
  0xcb   : > { %1014 = vmatpush.msra.mxu2 %v830_v62  ;;  %1057 = vmatpush.msra.mxu3 %v2092_v21 }
  0xcc   : > { %905 = vmatmul.f32.vlgmr.msra.gmra.mxu0 %v2185_v34  ;;  %939 = vmatpush.msra.mxu1 %v2092_v21  ;;  %v1346_v34 = vld [vmem:[%s288_s23] ss:$0 sm:$0xff] }
  0xcd   : > { %1018 = vmatpush.msra.mxu2 %v836_v28  ;;  %1059 = vmatpush.msra.mxu3 %v2111_v30 }
  0xce   : > { %941 = vmatpush.msra.mxu1 %v2111_v30 }
  0xcf   : > { %1022 = vmatpush.msra.mxu2 %v842_v39  ;;  %1061 = vmatpush.msra.mxu3 %v2130_v46 }
  0xd0   : > { %1024 = vmatmul.f32.vlgmr.msra.gmra.mxu2 %v2169_v16  ;;  %943 = vmatpush.msra.mxu1 %v2130_v46 }
  0xd1   : > { %1063 = vmatpush.msra.mxu3 %v2144_v40 }
  0xd2   : > { %1065 = vmatmul.f32.vlgmr.msra.gmra.mxu3 %v2169_v16  ;;  %945 = vmatpush.msra.mxu1 %v2144_v40 }
  0xd3   : > { %949 = vmatmul.f32.vlgmr.msra.gmra.mxu1 %v735_v2 }
  0xd4   : > { %910 = vmatmul.f32.gmra.mxu0 %v2216_v25 }
  0xd8   : > { %1028 = vmatmul.f32.gmra.mxu2 %v2204_v54 }
  0xda   : > { %1069 = vmatmul.f32.gmra.mxu3 %v2204_v54 }
  0xdb   : > { %955 = vmatmul.f32.gmra.mxu1 %v743_v42 }
 0x118   : > { %v367_v24 = vpop.f32.mrf.mxu0 }
 0x11e   : > { %v476_v33 = vpop.f32.mrf.mxu1 }
 0x11f   : > { %v477_v12 = vadd.f32 %v476_v33, %v367_v24 }
 0x120   : > { %v534_v18 = vpop.f32.mrf.mxu2  ;;  %v578_v7 = vpop.f32.mrf.mxu3 }
 0x121   : > { %v535_v15 = vadd.f32 %v534_v18, %v477_v12 }
 0x123   : > { %v579_v37 = vadd.f32 %v578_v7, %v535_v15 }
 0x126   : > { %v375_v38 = vpop.f32.mrf.mxu0 }
 0x129   : > { %v480_v6 = vpop.f32.mrf.mxu1  ;;  %v539_v14 = vpop.f32.mrf.mxu2 }
 0x12a   : > { %v481_v19 = vadd.f32 %v480_v6, %v375_v38 }
 0x12c   : > { %v584_v61 = vpop.f32.mrf.mxu3  ;;  %v540_v4 = vadd.f32 %v539_v14, %v481_v19 }
 0x12e   : > { %v585_v36 = vadd.f32 %v584_v61, %v540_v4 }
 0x131   : > { %v653_v57 = vpop.f32.mrf.mxu0 }
 0x132   : > { %v654_v21 = vadd.f32 %v653_v57, %v579_v37 }
 0x134   : > { %v694_v3 = vpop.f32.mrf.mxu1 }
 0x135   : > { %v739_v31 = vpop.f32.mrf.mxu2  ;;  %v695_v5 = vadd.f32 %v694_v3, %v654_v21 }
 0x137   : > { %v740_v46 = vadd.f32 %v739_v31, %v695_v5 }
 0x138   : > { %v848_v9 = vpop.f32.mrf.mxu3 }
 0x139   : > { %v849_v58 = vadd.f32 %v848_v9, %v740_v46 }
 0x13b   : > { %v657_v30 = vpop.f32.mrf.mxu0 }
 0x13c   : > { %v658_v0 = vadd.f32 %v657_v30, %v585_v36 }
 0x13e   : > { %v698_v10 = vpop.f32.mrf.mxu1 }
 0x13f   : > { %v747_v40 = vpop.f32.mrf.mxu2  ;;  %v699_v62 = vadd.f32 %v698_v10, %v658_v0 }
 0x141   : > { %v748_v60 = vadd.f32 %v747_v40, %v699_v62 }
 0x142   : > { %v852_v47 = vpop.f32.mrf.mxu3 }
 0x143   : > { %v853_v41 = vadd.f32 %v852_v47, %v748_v60 }
 0x149   : > { %v906_v52 = vpop.f32.mrf.mxu0 }
 0x14a   : > { %v907_v16 = vadd.f32 %v906_v52, %v849_v58 }
 0x150   : > { %v950_v28 = vpop.f32.mrf.mxu1 }
 0x151   : > { %v951_v48 = vadd.f32 %v950_v28, %v907_v16  ;;  %v911_v39 = vpop.f32.mrf.mxu0 }
 0x152   : > { %v912_v45 = vadd.f32 %v911_v39, %v853_v41 }
 0x153   : > { %v1025_v29 = vpop.f32.mrf.mxu2 }
 0x154   : > { %v1026_v11 = vadd.f32 %v1025_v29, %v951_v48 }
 0x155   : > { %v1066_v22 = vpop.f32.mrf.mxu3 }
 0x156   : > { %v1067_v17 = vadd.f32 %v1066_v22, %v1026_v11 }
 0x158   : > { %v1077_v53 = vmul.f32 %v1346_v34, %v1067_v17  ;;  %v956_v44 = vpop.f32.mrf.mxu1 }
 0x159   : > { %v957_v2 = vadd.f32 %v956_v44, %v912_v45 }
 0x15a   : > { %1079 = vst [vmem:[%s277_s16] sm:$0xff] %v1077_v53 }
 0x15b   : > { %v1029_v50 = vpop.f32.mrf.mxu2 }
 0x15c   : > { %v1030_v54 = vadd.f32 %v1029_v50, %v957_v2 }
 0x15d   : > { %v1070_v1 = vpop.f32.mrf.mxu3 }
 0x15e   : > { %v1071_v23 = vadd.f32 %v1070_v1, %v1030_v54 }
 0x160   : > { %v1078_v56 = vmul.f32 %v1346_v34, %v1071_v23 }
 0x162   : > { %1080 = vst [vmem:[%s277_s16 + $0x8] sm:$0xff] %v1078_v56 }
 0x163   : > { %1458 = shalt.err (!%p1455_p7)
}
 0x164   : > { %s1553_s13 = smov 128   ;;  %s1554_s20 = smov 384  }
 0x165   : > { %s1555_s23 = smov 8  }
 0x166   : > { %1241 = dma.vmem_to_hbm [thread:$0]  (%p1658_p8), %s1097_s8, 256, %s1099_s22, %s1082_s30, %s1553_s13, %s1554_s20, %s1555_s23  }
 0x167 PF: > { %p1262_p9 = scmp.ge.s32.totalorder %s1543_s7, 2  ;;  %s1113_s10 = sand.u32 1, %s1511_s26  }
 0x168   : > { %s1114_s3 = scalar_lea.sflag [#allocation7], %s1113_s10 }
 0x169   : > { %p1256_p10 = pnand %p1262_p9, %p1666_p11 }
 0x16b   : > { %p1257_p0 = pneg %p1256_p10 }
 0x16d   : > { %1506 = dma.done.wait (%p1257_p0), %s1114_s3, 256  }
 0x16e   : > { %1508 = vsyncadd (%p1257_p0), %s1114_s3, 4294967040  ;;  %s35_s7 = sadd.s32 1, %s1543_s7   ;;  %s2450_s1 = sld [smem:[#allocation19_spill]] }
 0x16f   : > { %p32_p1 = scmp.ge.s32.totalorder %s35_s7, 5   ;;  %s2451_s27 = sld [smem:[#allocation23_spill]] }
 0x170   : > { %s2452_s15 = sld [smem:[#allocation20_spill]]  ;;  %s2456_s26 = smov %s1515_s0 }
 0x171   : > { %s2453_s29 = sld [smem:[#allocation24_spill]] }
 0x172   : > { %s2454_s30 = sld [smem:[#allocation21_spill]]  ;;  %34 = sbr.rel (!%p32_p1) target bundleno = 17 (0x11), region = 85 }
 0x173   : > { %s2455_s6 = sld [smem:[#allocation22_spill]] }
 0x174   : > { %s2457_s0 = smov %s2450_s1  ;;  %s2458_s1 = smov %s1527_s28 }
 0x176   : > { %s2459_s28 = smov %s2452_s15 }
 0x177   :  { %1120 = vsyncpa [#allocation6], 1 }
 0x178   :  { %1122 = vsyncpa [#allocation6 + $0x1], 1 }
 0x179   :  { %1123 = vsyncpa [#allocation9], 1 }
 0x17a   :  { %1124 = vsyncpa [#allocation7], 1 }
 0x17b   :  { %1126 = vsyncpa [#allocation7 + $0x1], 1 }

</bundles_post_ra>
